<compile_context>
chip_gen: v5e
topology: v5e:2x2
jax: 0.10.0
libtpu: 0.0.40
codegen_flags: <defaults>
</compile_context>

<pallas_src>
import math
from functools import partial

import numpy as np

import jax
import jax.numpy as jnp
from jax.experimental import pallas as pl
from jax.experimental.pallas import tpu as pltpu

_LANE = 128      # last-dim padding target (lane-dense stores / full MXU width)
_SUBLANE = 8     # second-to-last-dim padding target (f32 sublanes)


def _round_up(x, m):
    return ((x + m - 1) // m) * m


# ----------------------------------------------------------------------------
# Fused Pallas kernel: MEAN aggregation + SageLayer matmuls + ReLU
# ----------------------------------------------------------------------------
def _fused_sage_kernel(neigh_ref, counts_ref, self_ref, w_self_ref, w_agg_ref,
                       out_ref):
    # neigh_ref : (K, Bp, Dp) f32  gathered neighbor features (zero-padded slots)
    # counts_ref: (Bp, 1)     f32  true neighbor count per row
    # self_ref  : (Bp, Dp)    bf16 self features
    # w_self_ref: (Dp, Op)    bf16 = W[:, :D].T  (pre-transposed at init)
    # w_agg_ref : (Dp, Op)    bf16 = W[:, D:].T
    # out_ref   : (Bp, Op)    f32  relu(self @ Wself_t + mean(neigh) @ Wagg_t)
    neigh_sum = jnp.sum(neigh_ref[...], axis=0)                  # (Bp, Dp) f32
    # Normalize AFTER the sum (B*D mults instead of B*U divides) and clamp the
    # count so isolated nodes (empty neighbor set) don't produce NaN/Inf.
    inv = 1.0 / jnp.maximum(counts_ref[...], 1.0)                # exact mean (f32)
    agg = neigh_sum * inv                                        # (Bp, Dp) f32

    acc = jnp.dot(self_ref[...], w_self_ref[...],
                  preferred_element_type=jnp.float32)
    acc = acc + jnp.dot(agg.astype(jnp.bfloat16), w_agg_ref[...],
                        preferred_element_type=jnp.float32)
    out_ref[...] = jnp.maximum(acc, 0.0)                         # ReLU in f32


@partial(jax.jit, static_argnames=("out_size",))
def _sage_layer_apply(pre_hidden, neigh_idx, counts, self_idx,
                      w_self_t, w_agg_t, *, out_size):
    """One GraphSage layer: gather (XLA) + fused Pallas kernel, all in one jit.

    pre_hidden: (N, D) f32 previous-layer embeddings
    neigh_idx : (B, K) int32 rows of pre_hidden per output node (pad slots = N)
    counts    : (B,)   f32 true neighbor counts
    self_idx  : (B,)   int32 rows of pre_hidden for the self features
    w_self_t  : (Dp, Op) bf16 padded W[:, :D].T
    w_agg_t   : (Dp, Op) bf16 padded W[:, D:].T
    """
    B, K = neigh_idx.shape
    D = pre_hidden.shape[1]
    Dp, Op = w_self_t.shape
    Bp = _round_up(max(B, 1), _SUBLANE)

    pre_f32 = pre_hidden.astype(jnp.float32)
    # Appended zero row: padded neighbor slots gather exact zeros.
    embed_ext = jnp.concatenate([pre_f32, jnp.zeros((1, D), jnp.float32)], axis=0)

    # Gather as (K, B, D) so the in-kernel reduction is over the leading axis.
    neigh = jnp.take(embed_ext, neigh_idx.T, axis=0)
    neigh = jnp.pad(neigh, ((0, 0), (0, Bp - B), (0, Dp - D)))

    self_feats = jnp.take(pre_f32, self_idx, axis=0).astype(jnp.bfloat16)
    self_feats = jnp.pad(self_feats, ((0, Bp - B), (0, Dp - D)))

    counts_col = jnp.pad(counts.astype(jnp.float32).reshape(B, 1),
                         ((0, Bp - B), (0, 0)))

    # NOTE: shapes here are tiny, so whole-array VMEM blocks are used.  For real
    # graph batches, tile Bp with a grid (block (128, Dp)) and mark the B axis
    # "parallel" in dimension_semantics so both v7x TensorCores split it.
    out = pl.pallas_call(
        _fused_sage_kernel,
        out_shape=jax.ShapeDtypeStruct((Bp, Op), jnp.float32),
        in_specs=[pl.BlockSpec(memory_space=pltpu.MemorySpace.VMEM)] * 5,
        out_specs=pl.BlockSpec(memory_space=pltpu.MemorySpace.VMEM),
    )(neigh, counts_col, self_feats, w_self_t, w_agg_t)

    return out[:B, :out_size]


# ----------------------------------------------------------------------------
# GraphSage module (host-side glue mirrors the PyTorch forward)
# ----------------------------------------------------------------------------
def _xavier_uniform(key, shape):
    fan_out, fan_in = shape  # torch 2-D: fan_in = size(1), fan_out = size(0)
    bound = math.sqrt(6.0 / (fan_in + fan_out))
    return jax.random.uniform(key, shape, jnp.float32, -bound, bound)


class GraphSage:
    def __init__(self, num_layers, input_size, out_size, raw_features,
                 adj_lists, gcn=False, agg_func='MEAN', seed=0):
        if gcn:
            # TODO(synk): gcn=True (aggregate-only, no concat) variant not ported.
            raise NotImplementedError("gcn=True not implemented")
        self.input_size = input_size
        self.out_size = out_size
        self.num_layers = num_layers
        self.gcn = gcn
        self.agg_func = agg_func
        self.raw_features = jnp.asarray(raw_features, dtype=jnp.float32)
        self.adj_lists = adj_lists

        # Xavier-uniform (out, 2*in) exactly like the torch SageLayer, then
        # pre-split / pre-transposed / zero-padded / bf16-cast ONCE so the
        # per-call path has no slice/transpose XLA ops.
        self._weights_f32 = {}
        self.w_self_t = {}
        self.w_agg_t = {}
        key = jax.random.PRNGKey(seed)
        keys = jax.random.split(key, num_layers)
        for index in range(1, num_layers + 1):
            layer_size = out_size if index != 1 else input_size
            w = _xavier_uniform(keys[index - 1], (out_size, 2 * layer_size))
            self._weights_f32[index] = w
            dp = _round_up(layer_size, _LANE)
            op = _round_up(out_size, _LANE)
            w_self_t = jnp.zeros((dp, op), jnp.bfloat16)
            w_self_t = w_self_t.at[:layer_size, :out_size].set(
                w[:, :layer_size].T.astype(jnp.bfloat16))
            w_agg_t = jnp.zeros((dp, op), jnp.bfloat16)
            w_agg_t = w_agg_t.at[:layer_size, :out_size].set(
                w[:, layer_size:].T.astype(jnp.bfloat16))
            self.w_self_t[index] = w_self_t
            self.w_agg_t[index] = w_agg_t

    # ------------------------------------------------------------------ forward
    def forward(self, nodes_batch):
        lower_layer_nodes = list(nodes_batch)
        nodes_batch_layers = [(lower_layer_nodes,)]
        for _ in range(self.num_layers):
            lower_samp_neighs, lower_layer_nodes_dict, lower_layer_nodes = \
                self._get_unique_neighs_list(lower_layer_nodes)
            nodes_batch_layers.insert(
                0, (lower_layer_nodes, lower_samp_neighs, lower_layer_nodes_dict))
        assert len(nodes_batch_layers) == self.num_layers + 1

        pre_hidden_embs = self.raw_features
        for index in range(1, self.num_layers + 1):
            nb = nodes_batch_layers[index][0]
            pre_neighs = nodes_batch_layers[index - 1]
            # Compact int32 neighbor table + counts (no dense (B, U) mask).
            neigh_idx, counts = self._build_neighbor_index(
                nb, pre_hidden_embs, pre_neighs)
            if index > 1:
                nb = self._nodes_map(nb, pre_hidden_embs, pre_neighs)
            self_idx = np.asarray(nb, dtype=np.int32)
            pre_hidden_embs = _sage_layer_apply(
                pre_hidden_embs,
                jnp.asarray(neigh_idx), jnp.asarray(counts),
                jnp.asarray(self_idx),
                self.w_self_t[index], self.w_agg_t[index],
                out_size=self.out_size)
        return pre_hidden_embs

    # ----------------------------------------------------------------- helpers
    def _nodes_map(self, nodes, hidden_embs, neighs):
        layer_nodes, samp_neighs, layer_nodes_dict = neighs
        assert len(samp_neighs) == len(nodes)
        return [layer_nodes_dict[x] for x in nodes]

    def _get_unique_neighs_list(self, nodes, num_sample=10):
        _set = set
        to_neighs = [self.adj_lists[int(node)] for node in nodes]
        if num_sample is not None:
            # our synthetic graph keeps degree < num_sample so no sampling fires
            samp_neighs = [set(to_neigh) if len(to_neigh) < num_sample
                           else set(list(to_neigh)[:num_sample])
                           for to_neigh in to_neighs]
        else:
            samp_neighs = [set(t) for t in to_neighs]
        samp_neighs = [samp_neigh | _set([nodes[i]])
                       for i, samp_neigh in enumerate(samp_neighs)]
        _unique_nodes_list = list(set.union(*samp_neighs))
        i = list(range(len(_unique_nodes_list)))
        unique_nodes = dict(list(zip(_unique_nodes_list, i)))
        return samp_neighs, unique_nodes, _unique_nodes_list

    def _build_neighbor_index(self, nodes, pre_hidden_embs, pre_neighs):
        """Replaces the original dense (B, U) mask with a (B, K) int32 gather
        table (rows of pre_hidden_embs) plus per-row neighbor counts.  Padded
        slots point at the zero row appended inside the jitted layer."""
        unique_nodes_list, samp_neighs, unique_nodes = pre_neighs
        assert len(nodes) == len(samp_neighs)
        indicator = [nodes[i] in samp_neighs[i] for i in range(len(samp_neighs))]
        assert False not in indicator
        if not self.gcn:
            samp_neighs = [samp_neighs[i] - set([nodes[i]])
                           for i in range(len(samp_neighs))]
        if self.agg_func != 'MEAN':
            # TODO(synk): MAX aggregation (ragged per-row max) not ported.
            raise NotImplementedError("only MEAN aggregation is implemented")

        # Map graph node id -> row of pre_hidden_embs, mirroring the original
        # embed_matrix = pre_hidden_embs[unique_nodes_list] selection.
        if len(pre_hidden_embs) == len(unique_nodes):
            row_of = lambda n: unique_nodes[n]
        else:
            row_of = lambda n: int(n)

        B = len(samp_neighs)
        counts = np.array([len(s) for s in samp_neighs], dtype=np.float32)
        k_max = int(max(1.0, counts.max())) if B else 1
        K = _round_up(k_max, _SUBLANE)
        pad_row = int(len(pre_hidden_embs))   # index of the appended zero row
        neigh_idx = np.full((B, K), pad_row, dtype=np.int32)
        for i, s in enumerate(samp_neighs):
            for j, n in enumerate(s):
                neigh_idx[i, j] = row_of(n)
        return neigh_idx, counts


# ----------------------------------------------------------------------------
# Pure-numpy reference (mirrors the original torch math, f32, dense mask)
# ----------------------------------------------------------------------------
def _reference_forward(model, nodes_batch):
    lower = list(nodes_batch)
    layers = [(lower,)]
    for _ in range(model.num_layers):
        sn, d, lower = model._get_unique_neighs_list(lower)
        layers.insert(0, (lower, sn, d))
    pre = np.asarray(model.raw_features, dtype=np.float32)
    for index in range(1, model.num_layers + 1):
        nb = layers[index][0]
        unique_nodes_list, samp_neighs, unique_nodes = layers[index - 1]
        samp = [samp_neighs[i] - {nb[i]} for i in range(len(samp_neighs))]
        if len(pre) == len(unique_nodes):
            embed = pre
        else:
            embed = pre[np.asarray(unique_nodes_list, dtype=np.int64)]
        mask = np.zeros((len(samp), len(unique_nodes)), np.float32)
        for i, s in enumerate(samp):
            for n in s:
                mask[i, unique_nodes[n]] = 1.0
        cnt = np.maximum(mask.sum(1, keepdims=True), 1.0)
        agg = (mask / cnt) @ embed
        if index > 1:
            nb_idx = [unique_nodes[x] for x in nb]
        else:
            nb_idx = [int(x) for x in nb]
        self_feats = pre[np.asarray(nb_idx, dtype=np.int64)]
        w = np.asarray(model._weights_f32[index], dtype=np.float32)
        combined = np.concatenate([self_feats, agg], axis=1)
        pre = np.maximum(w @ combined.T, 0.0).T
    return pre


# ----------------------------------------------------------------------------
# Example run
# ----------------------------------------------------------------------------
if __name__ == "__main__":
    num_nodes = 32
    input_size = 32
    out_size = 32
    num_layers = 2

    # deterministic synthetic graph: node i <-> {i+1, ..., i+6} (mod N)
    adj_lists = {i: {(i + k) % num_nodes for k in range(1, 7)}
                 for i in range(num_nodes)}

    key = jax.random.PRNGKey(0)
    feat_key, _ = jax.random.split(key)
    raw_features = jax.random.normal(feat_key, (num_nodes, input_size),
                                     dtype=jnp.float32)

    model = GraphSage(num_layers=num_layers, input_size=input_size,
                      out_size=out_size, raw_features=raw_features,
                      adj_lists=adj_lists, gcn=False, agg_func='MEAN', seed=0)

    nodes_batch = list(range(8))
    out = model.forward(nodes_batch)
    out = jax.block_until_ready(out)

    assert out.shape == (len(nodes_batch), out_size)
    out_np = np.asarray(out)
    assert np.all(np.isfinite(out_np))

    # Correctness sanity check vs. the f32 dense-mask reference (bf16 matmul
    # operands in the kernel -> loose tolerance).
    ref = _reference_forward(model, nodes_batch)
    np.testing.assert_allclose(out_np, ref, rtol=1e-1, atol=1e-1)

    print("KERNEL_OK")
</pallas_src>

<mosaic_0001>
module attributes {stable_mosaic.version = 11 : i64} {
  func.func @_fused_sage_kernel(%arg0: memref<8x16x128xf32, #tpu.memory_space<vmem>>, %arg1: memref<16x1xf32, #tpu.memory_space<vmem>>, %arg2: memref<16x128xbf16, #tpu.memory_space<vmem>>, %arg3: memref<128x128xbf16, #tpu.memory_space<vmem>>, %arg4: memref<128x128xbf16, #tpu.memory_space<vmem>>, %arg5: memref<16x128xf32, #tpu.memory_space<vmem>>) attributes {dimension_semantics = [], scalar_prefetch = 0 : i64, scratch_operands = 0 : i64, tpu.core_type = #tpu.core_type<tc>} {
    %c0 = arith.constant 0 : index
    %c0_0 = arith.constant 0 : index
    %c0_1 = arith.constant 0 : index
    %0 = vector.load %arg0[%c0, %c0_0, %c0_1] : memref<8x16x128xf32, #tpu.memory_space<vmem>>, vector<8x16x128xf32>
    %cst = arith.constant dense<0.000000e+00> : vector<16x128xf32>
    %1 = vector.multi_reduction <add>, %0, %cst [0] : vector<8x16x128xf32> to vector<16x128xf32>
    %c0_2 = arith.constant 0 : index
    %c0_3 = arith.constant 0 : index
    %2 = vector.load %arg1[%c0_2, %c0_3] : memref<16x1xf32, #tpu.memory_space<vmem>>, vector<16x1xf32>
    %cst_4 = arith.constant 1.000000e+00 : f32
    %3 = vector.broadcast %cst_4 : f32 to vector<16x1xf32>
    %4 = arith.maximumf %2, %3 : vector<16x1xf32>
    %cst_5 = arith.constant 1.000000e+00 : f32
    %5 = vector.broadcast %cst_5 : f32 to vector<16x1xf32>
    %6 = arith.divf %5, %4 : vector<16x1xf32>
    %7 = vector.broadcast %6 : vector<16x1xf32> to vector<16x128xf32>
    %8 = arith.mulf %1, %7 : vector<16x128xf32>
    %c0_6 = arith.constant 0 : index
    %c0_7 = arith.constant 0 : index
    %9 = vector.load %arg2[%c0_6, %c0_7] : memref<16x128xbf16, #tpu.memory_space<vmem>>, vector<16x128xbf16>
    %c0_8 = arith.constant 0 : index
    %c0_9 = arith.constant 0 : index
    %10 = vector.load %arg3[%c0_8, %c0_9] : memref<128x128xbf16, #tpu.memory_space<vmem>>, vector<128x128xbf16>
    %cst_10 = arith.constant dense<0.000000e+00> : vector<16x128xf32>
    %11 = tpu.matmul %9, %10, %cst_10 {dimension_numbers = #tpu.dot_dimension_numbers<[1], [0], [0], [1], [0, 0, 1, 1], [], []>} : vector<16x128xbf16>, vector<128x128xbf16>, vector<16x128xf32> -> vector<16x128xf32>
    %12 = arith.truncf %8 : vector<16x128xf32> to vector<16x128xbf16>
    %c0_11 = arith.constant 0 : index
    %c0_12 = arith.constant 0 : index
    %13 = vector.load %arg4[%c0_11, %c0_12] : memref<128x128xbf16, #tpu.memory_space<vmem>>, vector<128x128xbf16>
    %cst_13 = arith.constant dense<0.000000e+00> : vector<16x128xf32>
    %14 = tpu.matmul %12, %13, %cst_13 {dimension_numbers = #tpu.dot_dimension_numbers<[1], [0], [0], [1], [0, 0, 1, 1], [], []>} : vector<16x128xbf16>, vector<128x128xbf16>, vector<16x128xf32> -> vector<16x128xf32>
    %15 = arith.addf %11, %14 : vector<16x128xf32>
    %cst_14 = arith.constant 0.000000e+00 : f32
    %16 = vector.broadcast %cst_14 : f32 to vector<16x128xf32>
    %17 = arith.maximumf %15, %16 : vector<16x128xf32>
    %c0_15 = arith.constant 0 : index
    %c0_16 = arith.constant 0 : index
    %18 = vector.load %arg5[%c0_15, %c0_16] : memref<16x128xf32, #tpu.memory_space<vmem>>, vector<16x128xf32>
    tpu.vector_store %arg5[%c0_15, %c0_16], %17 {strides = array<i32>} : memref<16x128xf32, #tpu.memory_space<vmem>>, vector<16x128xf32>,
    return
  }
}

</mosaic_0001>

<bundles_post_ra>
// kernel: _sage_layer_apply.1
= control target key start
LH: loop header
LB: loop body
LE: loop exit
PB: predicated region body
PF: predicated region fallthrough
CT: control target
= control target key end

     0   :  { %v404_v3 = vmov 0   ;;  %s552_s0 = inlined_call_operand.vmem [shape: f32[8,16,128], index: 0, kind: input, shape index: {}]   ;;  %s553_s1 = inlined_call_operand.vmem [shape: f32[16,1], index: 1, kind: input, shape index: {}]   ;;  %s554_s2 = inlined_call_operand.vmem [shape: bf16[16,128], index: 2, kind: input, shape index: {}]   ;;  %s555_s3 = inlined_call_operand.vmem [shape: bf16[128,128], index: 3, kind: input, shape index: {}]   ;;  %s556_s4 = inlined_call_operand.vmem [shape: bf16[128,128], index: 4, kind: input, shape index: {}]   ;;  %s557_s5 = inlined_call_operand.hbm [shape: f32[16,128], index: 5, kind: output, shape index: {}]  }
   0x1   :  { %v51_v0 = vld [vmem:[%s553_s1] sm:$0xff]  ;;  %v52_v1 = vld [vmem:[%s553_s1 + $0x8] sm:$0xff]  ;;  %v360_v2 = vld [vmem:[%s555_s3 + $0x38] sm:$0xff]  ;;  %373 = vset.pattern.permute.xlu0 %v404_v3 }
   0x2   :  { %v53_v4 = vmax.f32 %v51_v0, 1.0  ;;  %v54_v5 = vmax.f32 %v52_v1, 1.0  ;;  %v368_v6 = vld [vmem:[%s556_s4 + $0x38] sm:$0xff]  ;;  %248 = vmatpush.bf16.msra.mxu1 %v360_v2  ;;  %v359_v7 = vld [vmem:[%s555_s3 + $0x30] sm:$0xff] }
   0x3   :  { %180 = vmatpush.bf16.msra.mxu0 %v368_v6  ;;  %v367_v8 = vld [vmem:[%s556_s4 + $0x30] sm:$0xff] }
   0x4   :  { %374 = vrcp.f32 %v53_v4 }
   0x5   :  { %376 = vrcp.f32 %v54_v5 }
   0x6   :  { %10 = vsyncpa [#allocation3], 0  ;;  %249 = vmatpush.bf16.msra.mxu1 %v359_v7  ;;  %v358_v9 = vld [vmem:[%s555_s3 + $0x28] sm:$0xff]  ;;  %v357_v14 = vld [vmem:[%s555_s3 + $0x20] sm:$0xff]  ;;  %v66_v15 = vand.u32 2147483648, %v53_v4  ;;  %vm60_vm0 = vweird.f32 %v53_v4  ;;  %vm75_vm4 = vweird.f32 %v54_v5  ;;  %v81_v28 = vand.u32 2147483648, %v54_v5 }
   0x7   :  { %181 = vmatpush.bf16.msra.mxu0 %v367_v8  ;;  %v366_v10 = vld [vmem:[%s556_s4 + $0x28] sm:$0xff]  ;;  %v365_v17 = vld [vmem:[%s556_s4 + $0x20] sm:$0xff]  ;;  %v64_v19 = vand.u32 2147483647, %v53_v4  ;;  %v356_v22 = vld [vmem:[%s555_s3 + $0x18] sm:$0xff]  ;;  %s405_s6 = smov [#allocation2]  }
   0x8   :  { %v67_v24 = vor.u32 1.1754944e-38, %v66_v15  ;;  %v364_v26 = vld [vmem:[%s556_s4 + $0x18] sm:$0xff]  ;;  %v79_v31 = vand.u32 2147483647, %v54_v5  ;;  %v355_v32 = vld [vmem:[%s555_s3 + $0x10] sm:$0xff]  ;;  %v82_v34 = vor.u32 1.1754944e-38, %v81_v28 }
   0x9   :  { %vm65_vm3 = vcmp.eq.f32.partialorder %v64_v19, 8.507059e+37  ;;  %v354_v36 = vld [vmem:[%s555_s3 + $0x8] sm:$0xff]  ;;  %v363_v38 = vld [vmem:[%s556_s4 + $0x10] sm:$0xff]  ;;  %v353_v39 = vld [vmem:[%s555_s3] sm:$0xff]  ;;  %s272_s9 = sshll.u32 %s557_s5, 4  ;;  %s273_s9 = int_to_ptr.hbm [resolvable:$true] %s272_s9 }
   0xa   :  { %v375_v11 = vpop.eup %374  ;;  %250 = vmatpush.bf16.msra.mxu1 %v358_v9  ;;  %vm80_vm7 = vcmp.eq.f32.partialorder %v79_v31, 8.507059e+37  ;;  %v352_v40 = vld [vmem:[%s554_s2] sm:$0xff]  ;;  %v362_v41 = vld [vmem:[%s556_s4 + $0x8] sm:$0xff]  ;;  %v23_v44 = vld [vmem:[%s552_s0 + $0x10] sm:$0xff]  ;;  %s270_s2 = sshll.u32 %s405_s6, 4  ;;  %s271_s2 = int_to_ptr.vmem [resolvable:$true] %s270_s2 }
   0xb   :  { %v377_v12 = vpop.eup %376  ;;  %v56_v13 = vmul.f32 %v375_v11, %v53_v4  ;;  %182 = vmatpush.bf16.msra.mxu0 %v366_v10  ;;  %vm61_vm1 = vweird.f32 %v375_v11  ;;  %v361_v42 = vld [vmem:[%s556_s4] sm:$0xff]  ;;  %v22_v45 = vld [vmem:[%s552_s0 + $0x8] sm:$0xff]  ;;  %v24_v46 = vld [vmem:[%s552_s0 + $0x18] sm:$0xff]  ;;  %s407_s4 = smov 8  }
   0xc   :  { %v71_v16 = vmul.f32 %v377_v12, %v54_v5  ;;  %vm471_vm2 = vmor %vm60_vm0, %vm61_vm1  ;;  %vm76_vm5 = vweird.f32 %v377_v12  ;;  %v21_v43 = vld [vmem:[%s552_s0] sm:$0xff]  ;;  %v44_v48 = vadd.f32 %v24_v46, %v22_v45  ;;  %v26_v50 = vld [vmem:[%s552_s0 + $0x28] sm:$0xff] }
   0xd   :  { %v57_v18 = vsub.f32 1.0, %v56_v13  ;;  %vm77_vm6 = vmor %vm75_vm4, %vm76_vm5  ;;  %v37_v47 = vadd.f32 %v23_v44, %v21_v43  ;;  %v25_v49 = vld [vmem:[%s552_s0 + $0x20] sm:$0xff]  ;;  %v27_v53 = vld [vmem:[%s552_s0 + $0x30] sm:$0xff] }
   0xe   :  { %v72_v20 = vsub.f32 1.0, %v71_v16  ;;  %251 = vmatpush.bf16.msra.mxu1 %v357_v14  ;;  %v45_v52 = vadd.f32 %v44_v48, %v26_v50  ;;  %v28_v54 = vld [vmem:[%s552_s0 + $0x38] sm:$0xff]  ;;  %v29_v57 = vld [vmem:[%s552_s0 + $0x40] sm:$0xff]  ;;  %v30_v58 = vld [vmem:[%s552_s0 + $0x48] sm:$0xff] }
   0xf   :  { %v58_v21 = vmul.f32 %v375_v11, %v57_v18  ;;  %183 = vmatpush.bf16.msra.mxu0 %v365_v17  ;;  %v38_v51 = vadd.f32 %v37_v47, %v25_v49  ;;  %v31_v61 = vld [vmem:[%s552_s0 + $0x50] sm:$0xff]  ;;  %v32_v62 = vld [vmem:[%s552_s0 + $0x58] sm:$0xff]  ;;  %v33_v1 = vld [vmem:[%s552_s0 + $0x60] sm:$0xff] }
  0x10   :  { %v73_v25 = vmul.f32 %v377_v12, %v72_v20  ;;  %v46_v56 = vadd.f32 %v45_v52, %v28_v54  ;;  %v34_v2 = vld [vmem:[%s552_s0 + $0x68] sm:$0xff]  ;;  %v35_v6 = vld [vmem:[%s552_s0 + $0x70] sm:$0xff]  ;;  %v36_v7 = vld [vmem:[%s552_s0 + $0x78] sm:$0xff]  ;;  %s406_s0 = smov 128  }
  0x11   :  { %v59_v27 = vadd.f32 %v375_v11, %v58_v21  ;;  %v39_v55 = vadd.f32 %v38_v51, %v27_v53 }
  0x12   :  { %v74_v30 = vadd.f32 %v377_v12, %v73_v25  ;;  %252 = vmatpush.bf16.msra.mxu1 %v356_v22  ;;  %v47_v60 = vadd.f32 %v46_v56, %v30_v58 }
  0x13   :  { %v63_v29 = vsel %vm471_vm2, %v375_v11, %v59_v27  ;;  %184 = vmatpush.bf16.msra.mxu0 %v364_v26  ;;  %v40_v59 = vadd.f32 %v39_v55, %v29_v57 }
  0x14   :  { %v68_v33 = vsel %vm65_vm3, %v67_v24, %v63_v29  ;;  %v78_v35 = vsel %vm77_vm6, %v377_v12, %v74_v30  ;;  %v48_v0 = vadd.f32 %v47_v60, %v32_v62 }
  0x15   :  { %87 = vperm.xlu0 %373, %v68_v33   ;;  %v83_v37 = vsel %vm80_vm7, %v82_v34, %v78_v35  ;;  %v41_v63 = vadd.f32 %v40_v59, %v31_v61 }
  0x16   :  { %253 = vmatpush.bf16.msra.mxu1 %v355_v32  ;;  %v49_v5 = vadd.f32 %v48_v0, %v34_v2 }
  0x17   :  { %185 = vmatpush.bf16.msra.mxu0 %v363_v38  ;;  %v42_v4 = vadd.f32 %v41_v63, %v33_v1 }
  0x18   :  { %v50_v9 = vadd.f32 %v49_v5, %v36_v7 }
  0x19   :  { %v43_v8 = vadd.f32 %v42_v4, %v35_v6 }
  0x1a   :  { %254 = vmatpush.bf16.msra.mxu1 %v354_v36 }
  0x1b   :  { %186 = vmatpush.bf16.msra.mxu0 %v362_v41 }
  0x1d   :  { %92 = vperm.xlu0 %373, %v83_v37  }
  0x1e   :  { %255 = vmatpush.bf16.msra.mxu1 %v353_v39 }
  0x1f   :  { %187 = vmatpush.bf16.msra.mxu0 %v361_v42 }
  0x21   :  { %256 = vmatmul.bf16.vlgmr.msra.gmra.mxu1 %v352_v40 }
  0x87   :  { %v88_v3 = vpop.permute.xlu0 %87 }
  0x88   :  { %v95_v11 = vmul.f32 %v88_v3, %v43_v8 }
  0x8f   :  { %v93_v10 = vpop.permute.xlu0 %92 }
  0x90   :  { %v96_v12 = vmul.f32 %v93_v10, %v50_v9 }
  0x92   :  { %v115_v13 = vpack.c.bf16 %v96_v12, %v95_v11 }
  0x94   :  { %188 = vmatmul.bf16.vlgmr.msra.gmra.mxu0 %v115_v13 }
  0x9e   :  { %v257_v14 = vpop.f32.mrf.mxu1 }
  0xa6   :  { %v259_v18 = vpop.f32.mrf.mxu1 }
 0x111   :  { %v189_v15 = vpop.f32.mrf.mxu0 }
 0x112   :  { %v258_v16 = vadd.f32 %v257_v14, %v189_v15 }
 0x114   :  { %v262_v17 = vmax.f32 %v258_v16, 0.0 }
 0x116   :  { %264 = vst [vmem:[#allocation2] sm:$0xff] %v262_v17 }
 0x119   :  { %v191_v19 = vpop.f32.mrf.mxu0 }
 0x11a   :  { %v260_v20 = vadd.f32 %v259_v18, %v191_v19 }
 0x11c   :  { %v263_v21 = vmax.f32 %v260_v20, 0.0 }
 0x11e   :  { %265 = vst [vmem:[#allocation2 + $0x8] sm:$0xff] %v263_v21 }
 0x11f   :  { %278 = dma.vmem_to_hbm [thread:$0]  %s271_s2, 256, %s273_s9, [#allocation3], %s406_s0, %s406_s0, %s407_s4  }
 0x120   :  { %402 = dma.done.wait [#allocation3], 256  }
 0x121   :  { %403 = vsyncadd [#allocation3], 4294967040 }
 0x122   :  { %283 = vsyncpa [#allocation3], 1 }

</bundles_post_ra>
